<compile_context>
chip_gen: v7x
topology: tpu7x:2x2x1
jax: 0.10.0
libtpu: 0.0.40
codegen_flags: <defaults>
</compile_context>

<pallas_src>
import functools

import jax
import jax.numpy as jnp
from jax import lax
from jax.experimental import pallas as pl
from jax.experimental.pallas import tpu as pltpu

_EPS = 1e-5
_NUM_LAYERS = 5


def _round_up(n, m):
    return (n + m - 1) // m * m


def _fused_forward_kernel(*refs, lens):
    """One batch element per grid step; all activations resident in VMEM.

    refs layout:
      [x_ref, (w0, scale0, shift0), ..., (w4, scale4, shift4), o_ref,
       buf0, ..., buf4]

    x_ref : (1, L0, C_in)            this batch element, NLC (channels on lanes)
    w_i   : (3, C_in_i, C_out_i)     tap-major conv weights (bf16)
    scale_i, shift_i : (1, C_out_i)  folded eval-mode BN scale/shift (or 1/bias)
    o_ref : (1, 1, C_out)            pooled embedding (only HBM store)
    buf_i : (round_up(L_i+2, 8), C_i) f32 VMEM, zero-padded input of layer i
    """
    x_ref = refs[0]
    layer_refs = refs[1:1 + 3 * _NUM_LAYERS]
    o_ref = refs[1 + 3 * _NUM_LAYERS]
    bufs = refs[2 + 3 * _NUM_LAYERS:]

    # Zero only the two conv-padding rows of each layer buffer.  Interior rows
    # are always fully overwritten below, and trailing alignment rows are never
    # read (2*lout <= lin+1).
    for i, buf in enumerate(bufs):
        lin = lens[i]
        zrow = jnp.zeros((1, buf.shape[1]), buf.dtype)
        buf[pl.ds(0, 1), :] = zrow
        buf[pl.ds(lin + 1, 1), :] = zrow

    # Stage this batch element's input into the interior of the layer-0 buffer.
    bufs[0][pl.ds(1, lens[0]), :] = x_ref[0]

    for i in range(_NUM_LAYERS):
        w_ref, sc_ref, sh_ref = layer_refs[3 * i:3 * i + 3]
        lin, lout = lens[i], lens[i + 1]
        src = bufs[i]

        # Conv1d(k=3, s=2, p=1) as three accumulated tap matmuls on the MXU:
        #   y[t] = sum_k xp[2t + k] @ W[k]
        acc = None
        for k in range(3):
            tap = src[pl.ds(k, lout, 2), :].astype(jnp.bfloat16)
            part = jnp.dot(tap, w_ref[k], preferred_element_type=jnp.float32)
            acc = part if acc is None else acc + part

        y = acc * sc_ref[...] + sh_ref[...]          # folded BN (eval) / bias

        if i < _NUM_LAYERS - 1:
            y = jnp.maximum(y, 0.0)                  # ReLU
            bufs[i + 1][pl.ds(1, lout), :] = y       # interior rows only
        else:
            # avg_pool1d over the full remaining length -> (1, 1, C_out)
            o_ref[...] = jnp.mean(y, axis=0).reshape(1, 1, -1)


def voice_embed_forward(x_ncw, params):
    """x_ncw: (B, C_in, L) like PyTorch Conv1d input.  Returns (B, C_out, 1, 1)."""
    B, c_in, L = x_ncw.shape
    x_nlc = jnp.transpose(x_ncw, (0, 2, 1))          # NCW -> NLC

    lens = [L]
    for _ in range(_NUM_LAYERS):
        lens.append((lens[-1] - 1) // 2 + 1)         # conv k=3, s=2, p=1
    dims = [c_in] + [w.shape[-1] for (w, _, _) in params]
    c_out = dims[-1]

    # Static guard: stride-2 tap reads must stay inside the padded slab.
    for i in range(_NUM_LAYERS):
        lin, lout = lens[i], lens[i + 1]
        assert lout >= 1 and 2 * lout <= lin + 1, (lin, lout)

    in_specs = [pl.BlockSpec((1, L, c_in), lambda b: (b, 0, 0))]
    flat_args = [x_nlc]
    for (w, scale, shift) in params:
        _, ci, co = w.shape
        in_specs += [
            pl.BlockSpec((3, ci, co), lambda b: (0, 0, 0)),
            pl.BlockSpec((1, co), lambda b: (0, 0)),
            pl.BlockSpec((1, co), lambda b: (0, 0)),
        ]
        flat_args += [w, scale, shift]

    scratch_shapes = [
        pltpu.VMEM((_round_up(lens[i] + 2, 8), dims[i]), jnp.float32)
        for i in range(_NUM_LAYERS)
    ]

    kernel = functools.partial(_fused_forward_kernel, lens=tuple(lens))
    out = pl.pallas_call(
        kernel,
        grid=(B,),
        out_shape=jax.ShapeDtypeStruct((B, 1, c_out), jnp.float32),
        in_specs=in_specs,
        out_specs=pl.BlockSpec((1, 1, c_out), lambda b: (b, 0, 0)),
        scratch_shapes=scratch_shapes,
        compiler_params=pltpu.CompilerParams(
            dimension_semantics=("parallel",)),
    )(*flat_args)
    return out.reshape(B, c_out, 1, 1)               # x.view(B, -1, 1, 1)


def init_params(key, in_ch, channels, out_ch):
    """Deterministic synthetic parameters (same shapes as the PyTorch module),
    conv weights pre-arranged tap-major (3, Cin, Cout) in bf16."""
    dims = [in_ch] + list(channels) + [out_ch]
    params = []
    for i in range(_NUM_LAYERS):
        cin, cout = dims[i], dims[i + 1]
        key, k1, k2, k3, k4, k5 = jax.random.split(key, 6)
        # PyTorch Conv1d weight (Cout, Cin, 3) -> tap-major (3, Cin, Cout).
        w = jax.random.normal(k1, (cout, cin, 3), jnp.float32) / jnp.sqrt(3.0 * cin)
        w_taps = jnp.transpose(w, (2, 1, 0)).astype(jnp.bfloat16)
        if i < _NUM_LAYERS - 1:
            gamma = 1.0 + 0.1 * jax.random.normal(k2, (cout,), jnp.float32)
            beta = 0.1 * jax.random.normal(k3, (cout,), jnp.float32)
            rmean = 0.1 * jax.random.normal(k4, (cout,), jnp.float32)
            rvar = 1.0 + 0.1 * jax.random.uniform(k5, (cout,), jnp.float32)
            scale = gamma / jnp.sqrt(rvar + _EPS)    # eval-mode BN fold
            shift = beta - rmean * scale
        else:
            bias = 0.1 * jax.random.normal(k2, (cout,), jnp.float32)
            scale = jnp.ones((cout,), jnp.float32)
            shift = bias                             # final conv bias
        params.append((w_taps, scale.reshape(1, cout), shift.reshape(1, cout)))
    return params


def reference_forward(x_ncw, params):
    """Pure-JAX reference (f32 activations) of the same forward pass."""
    y = x_ncw
    for i, (w_taps, scale, shift) in enumerate(params):
        w = jnp.transpose(w_taps.astype(jnp.float32), (2, 1, 0))  # (Cout, Cin, 3)
        y = lax.conv_general_dilated(
            y, w, window_strides=(2,), padding=((1, 1),),
            dimension_numbers=("NCH", "OIH", "NCH"))
        y = y * scale.reshape(1, -1, 1) + shift.reshape(1, -1, 1)
        if i < _NUM_LAYERS - 1:
            y = jnp.maximum(y, 0.0)
    return jnp.mean(y, axis=-1).reshape(y.shape[0], -1, 1, 1)


if __name__ == "__main__":
    B, Cin, L = 2, 4, 64
    channels = (8, 16, 16, 32)
    out_ch = 32

    key = jax.random.PRNGKey(0)
    kx, kp = jax.random.split(key)
    x = jax.random.normal(kx, (B, Cin, L), jnp.float32)          # NCW, like PyTorch
    params = init_params(kp, Cin, channels, out_ch)

    y = voice_embed_forward(x, params)
    y = jax.block_until_ready(y)
    assert y.shape == (B, out_ch, 1, 1), y.shape
    assert bool(jnp.all(jnp.isfinite(y)))

    # Correctness vs. pure-JAX reference (tolerance covers bf16 MXU inputs).
    y_ref = reference_forward(x, params)
    assert bool(jnp.allclose(y, y_ref, rtol=5e-2, atol=5e-2)), (
        float(jnp.max(jnp.abs(y - y_ref))))
    print("KERNEL_OK")
</pallas_src>

<mosaic_0001>
module attributes {stable_mosaic.version = 11 : i64} {
  func.func @_fused_forward_kernel(%arg0: i32, %arg1: memref<1x64x4xf32, #tpu.memory_space<vmem>>, %arg2: memref<3x4x8xbf16, #tpu.memory_space<vmem>>, %arg3: memref<1x8xf32, #tpu.memory_space<vmem>>, %arg4: memref<1x8xf32, #tpu.memory_space<vmem>>, %arg5: memref<3x8x16xbf16, #tpu.memory_space<vmem>>, %arg6: memref<1x16xf32, #tpu.memory_space<vmem>>, %arg7: memref<1x16xf32, #tpu.memory_space<vmem>>, %arg8: memref<3x16x16xbf16, #tpu.memory_space<vmem>>, %arg9: memref<1x16xf32, #tpu.memory_space<vmem>>, %arg10: memref<1x16xf32, #tpu.memory_space<vmem>>, %arg11: memref<3x16x32xbf16, #tpu.memory_space<vmem>>, %arg12: memref<1x32xf32, #tpu.memory_space<vmem>>, %arg13: memref<1x32xf32, #tpu.memory_space<vmem>>, %arg14: memref<3x32x32xbf16, #tpu.memory_space<vmem>>, %arg15: memref<1x32xf32, #tpu.memory_space<vmem>>, %arg16: memref<1x32xf32, #tpu.memory_space<vmem>>, %arg17: memref<1x1x32xf32, #tpu.memory_space<vmem>>, %arg18: memref<72x4xf32, #tpu.memory_space<vmem>>, %arg19: memref<40x8xf32, #tpu.memory_space<vmem>>, %arg20: memref<24x16xf32, #tpu.memory_space<vmem>>, %arg21: memref<16x16xf32, #tpu.memory_space<vmem>>, %arg22: memref<8x32xf32, #tpu.memory_space<vmem>>) attributes {dimension_semantics = [#tpu.dimension_semantics<parallel>], iteration_bounds = array<i64: 2>, scalar_prefetch = 0 : i64, scratch_operands = 5 : i64, tpu.core_type = #tpu.core_type<tc>, window_params = [{transform_indices = @transform_0, window_bounds = array<i64: 1, 64, 4>}, {pipeline_mode = #tpu.pipeline_mode<synchronous>, transform_indices = @transform_1, window_bounds = array<i64: 3, 4, 8>}, {pipeline_mode = #tpu.pipeline_mode<synchronous>, transform_indices = @transform_2, window_bounds = array<i64: 1, 8>}, {pipeline_mode = #tpu.pipeline_mode<synchronous>, transform_indices = @transform_3, window_bounds = array<i64: 1, 8>}, {pipeline_mode = #tpu.pipeline_mode<synchronous>, transform_indices = @transform_4, window_bounds = array<i64: 3, 8, 16>}, {pipeline_mode = #tpu.pipeline_mode<synchronous>, transform_indices = @transform_5, window_bounds = array<i64: 1, 16>}, {pipeline_mode = #tpu.pipeline_mode<synchronous>, transform_indices = @transform_6, window_bounds = array<i64: 1, 16>}, {pipeline_mode = #tpu.pipeline_mode<synchronous>, transform_indices = @transform_7, window_bounds = array<i64: 3, 16, 16>}, {pipeline_mode = #tpu.pipeline_mode<synchronous>, transform_indices = @transform_8, window_bounds = array<i64: 1, 16>}, {pipeline_mode = #tpu.pipeline_mode<synchronous>, transform_indices = @transform_9, window_bounds = array<i64: 1, 16>}, {pipeline_mode = #tpu.pipeline_mode<synchronous>, transform_indices = @transform_10, window_bounds = array<i64: 3, 16, 32>}, {pipeline_mode = #tpu.pipeline_mode<synchronous>, transform_indices = @transform_11, window_bounds = array<i64: 1, 32>}, {pipeline_mode = #tpu.pipeline_mode<synchronous>, transform_indices = @transform_12, window_bounds = array<i64: 1, 32>}, {pipeline_mode = #tpu.pipeline_mode<synchronous>, transform_indices = @transform_13, window_bounds = array<i64: 3, 32, 32>}, {pipeline_mode = #tpu.pipeline_mode<synchronous>, transform_indices = @transform_14, window_bounds = array<i64: 1, 32>}, {pipeline_mode = #tpu.pipeline_mode<synchronous>, transform_indices = @transform_15, window_bounds = array<i64: 1, 32>}, {transform_indices = @transform_16, window_bounds = array<i64: 1, 1, 32>}]} {
    %cst = arith.constant 0.000000e+00 : f32
    %0 = vector.broadcast %cst : f32 to vector<1x4xf32>
    %c0 = arith.constant 0 : index
    %c0_0 = arith.constant 0 : index
    %1 = vector.load %arg18[%c0, %c0_0] : memref<72x4xf32, #tpu.memory_space<vmem>>, vector<1x4xf32>
    tpu.vector_store %arg18[%c0, %c0_0], %0 {strides = array<i32>} : memref<72x4xf32, #tpu.memory_space<vmem>>, vector<1x4xf32>,
    %c65 = arith.constant 65 : index
    %c0_1 = arith.constant 0 : index
    %2 = vector.load %arg18[%c65, %c0_1] : memref<72x4xf32, #tpu.memory_space<vmem>>, vector<1x4xf32>
    tpu.vector_store %arg18[%c65, %c0_1], %0 {strides = array<i32>} : memref<72x4xf32, #tpu.memory_space<vmem>>, vector<1x4xf32>,
    %cst_2 = arith.constant 0.000000e+00 : f32
    %3 = vector.broadcast %cst_2 : f32 to vector<1x8xf32>
    %c0_3 = arith.constant 0 : index
    %c0_4 = arith.constant 0 : index
    %4 = vector.load %arg19[%c0_3, %c0_4] : memref<40x8xf32, #tpu.memory_space<vmem>>, vector<1x8xf32>
    tpu.vector_store %arg19[%c0_3, %c0_4], %3 {strides = array<i32>} : memref<40x8xf32, #tpu.memory_space<vmem>>, vector<1x8xf32>,
    %c33 = arith.constant 33 : index
    %c0_5 = arith.constant 0 : index
    %5 = vector.load %arg19[%c33, %c0_5] : memref<40x8xf32, #tpu.memory_space<vmem>>, vector<1x8xf32>
    tpu.vector_store %arg19[%c33, %c0_5], %3 {strides = array<i32>} : memref<40x8xf32, #tpu.memory_space<vmem>>, vector<1x8xf32>,
    %cst_6 = arith.constant 0.000000e+00 : f32
    %6 = vector.broadcast %cst_6 : f32 to vector<1x16xf32>
    %c0_7 = arith.constant 0 : index
    %c0_8 = arith.constant 0 : index
    %7 = vector.load %arg20[%c0_7, %c0_8] : memref<24x16xf32, #tpu.memory_space<vmem>>, vector<1x16xf32>
    tpu.vector_store %arg20[%c0_7, %c0_8], %6 {strides = array<i32>} : memref<24x16xf32, #tpu.memory_space<vmem>>, vector<1x16xf32>,
    %c17 = arith.constant 17 : index
    %c0_9 = arith.constant 0 : index
    %8 = vector.load %arg20[%c17, %c0_9] : memref<24x16xf32, #tpu.memory_space<vmem>>, vector<1x16xf32>
    tpu.vector_store %arg20[%c17, %c0_9], %6 {strides = array<i32>} : memref<24x16xf32, #tpu.memory_space<vmem>>, vector<1x16xf32>,
    %cst_10 = arith.constant 0.000000e+00 : f32
    %9 = vector.broadcast %cst_10 : f32 to vector<1x16xf32>
    %c0_11 = arith.constant 0 : index
    %c0_12 = arith.constant 0 : index
    %10 = vector.load %arg21[%c0_11, %c0_12] : memref<16x16xf32, #tpu.memory_space<vmem>>, vector<1x16xf32>
    tpu.vector_store %arg21[%c0_11, %c0_12], %9 {strides = array<i32>} : memref<16x16xf32, #tpu.memory_space<vmem>>, vector<1x16xf32>,
    %c9 = arith.constant 9 : index
    %c0_13 = arith.constant 0 : index
    %11 = vector.load %arg21[%c9, %c0_13] : memref<16x16xf32, #tpu.memory_space<vmem>>, vector<1x16xf32>
    tpu.vector_store %arg21[%c9, %c0_13], %9 {strides = array<i32>} : memref<16x16xf32, #tpu.memory_space<vmem>>, vector<1x16xf32>,
    %cst_14 = arith.constant 0.000000e+00 : f32
    %12 = vector.broadcast %cst_14 : f32 to vector<1x32xf32>
    %c0_15 = arith.constant 0 : index
    %c0_16 = arith.constant 0 : index
    %13 = vector.load %arg22[%c0_15, %c0_16] : memref<8x32xf32, #tpu.memory_space<vmem>>, vector<1x32xf32>
    tpu.vector_store %arg22[%c0_15, %c0_16], %12 {strides = array<i32>} : memref<8x32xf32, #tpu.memory_space<vmem>>, vector<1x32xf32>,
    %c5 = arith.constant 5 : index
    %c0_17 = arith.constant 0 : index
    %14 = vector.load %arg22[%c5, %c0_17] : memref<8x32xf32, #tpu.memory_space<vmem>>, vector<1x32xf32>
    tpu.vector_store %arg22[%c5, %c0_17], %12 {strides = array<i32>} : memref<8x32xf32, #tpu.memory_space<vmem>>, vector<1x32xf32>,
    %c0_18 = arith.constant 0 : index
    %c0_19 = arith.constant 0 : index
    %c0_20 = arith.constant 0 : index
    %15 = vector.load %arg1[%c0_18, %c0_19, %c0_20] : memref<1x64x4xf32, #tpu.memory_space<vmem>>, vector<1x64x4xf32>
    %16 = vector.shape_cast %15 : vector<1x64x4xf32> to vector<64x4xf32>
    %c1 = arith.constant 1 : index
    %c0_21 = arith.constant 0 : index
    %17 = vector.load %arg18[%c1, %c0_21] : memref<72x4xf32, #tpu.memory_space<vmem>>, vector<64x4xf32>
    tpu.vector_store %arg18[%c1, %c0_21], %16 {strides = array<i32>} : memref<72x4xf32, #tpu.memory_space<vmem>>, vector<64x4xf32>,
    %c0_22 = arith.constant 0 : index
    %c0_23 = arith.constant 0 : index
    %18 = tpu.strided_load %arg18[%c0_22, %c0_23] {strides = array<i32: 2, 1>} : memref<72x4xf32, #tpu.memory_space<vmem>>, vector<32x4xf32>
    %19 = arith.truncf %18 : vector<32x4xf32> to vector<32x4xbf16>
    %c0_24 = arith.constant 0 : index
    %c0_25 = arith.constant 0 : index
    %c0_26 = arith.constant 0 : index
    %20 = vector.load %arg2[%c0_24, %c0_25, %c0_26] : memref<3x4x8xbf16, #tpu.memory_space<vmem>>, vector<1x4x8xbf16>
    %21 = vector.shape_cast %20 : vector<1x4x8xbf16> to vector<4x8xbf16>
    %cst_27 = arith.constant dense<0.000000e+00> : vector<32x8xf32>
    %22 = tpu.matmul %19, %21, %cst_27 {dimension_numbers = #tpu.dot_dimension_numbers<[1], [0], [0], [1], [0, 0, 1, 1], [], []>} : vector<32x4xbf16>, vector<4x8xbf16>, vector<32x8xf32> -> vector<32x8xf32>
    %c1_28 = arith.constant 1 : index
    %c0_29 = arith.constant 0 : index
    %23 = tpu.strided_load %arg18[%c1_28, %c0_29] {strides = array<i32: 2, 1>} : memref<72x4xf32, #tpu.memory_space<vmem>>, vector<32x4xf32>
    %24 = arith.truncf %23 : vector<32x4xf32> to vector<32x4xbf16>
    %c1_30 = arith.constant 1 : index
    %c0_31 = arith.constant 0 : index
    %c0_32 = arith.constant 0 : index
    %25 = vector.load %arg2[%c1_30, %c0_31, %c0_32] : memref<3x4x8xbf16, #tpu.memory_space<vmem>>, vector<1x4x8xbf16>
    %26 = vector.shape_cast %25 : vector<1x4x8xbf16> to vector<4x8xbf16>
    %cst_33 = arith.constant dense<0.000000e+00> : vector<32x8xf32>
    %27 = tpu.matmul %24, %26, %cst_33 {dimension_numbers = #tpu.dot_dimension_numbers<[1], [0], [0], [1], [0, 0, 1, 1], [], []>} : vector<32x4xbf16>, vector<4x8xbf16>, vector<32x8xf32> -> vector<32x8xf32>
    %28 = arith.addf %22, %27 : vector<32x8xf32>
    %c2 = arith.constant 2 : index
    %c0_34 = arith.constant 0 : index
    %29 = tpu.strided_load %arg18[%c2, %c0_34] {strides = array<i32: 2, 1>} : memref<72x4xf32, #tpu.memory_space<vmem>>, vector<32x4xf32>
    %30 = arith.truncf %29 : vector<32x4xf32> to vector<32x4xbf16>
    %c2_35 = arith.constant 2 : index
    %c0_36 = arith.constant 0 : index
    %c0_37 = arith.constant 0 : index
    %31 = vector.load %arg2[%c2_35, %c0_36, %c0_37] : memref<3x4x8xbf16, #tpu.memory_space<vmem>>, vector<1x4x8xbf16>
    %32 = vector.shape_cast %31 : vector<1x4x8xbf16> to vector<4x8xbf16>
    %cst_38 = arith.constant dense<0.000000e+00> : vector<32x8xf32>
    %33 = tpu.matmul %30, %32, %cst_38 {dimension_numbers = #tpu.dot_dimension_numbers<[1], [0], [0], [1], [0, 0, 1, 1], [], []>} : vector<32x4xbf16>, vector<4x8xbf16>, vector<32x8xf32> -> vector<32x8xf32>
    %34 = arith.addf %28, %33 : vector<32x8xf32>
    %c0_39 = arith.constant 0 : index
    %c0_40 = arith.constant 0 : index
    %35 = vector.load %arg3[%c0_39, %c0_40] : memref<1x8xf32, #tpu.memory_space<vmem>>, vector<1x8xf32>
    %36 = vector.broadcast %35 : vector<1x8xf32> to vector<32x8xf32>
    %37 = arith.mulf %34, %36 : vector<32x8xf32>
    %c0_41 = arith.constant 0 : index
    %c0_42 = arith.constant 0 : index
    %38 = vector.load %arg4[%c0_41, %c0_42] : memref<1x8xf32, #tpu.memory_space<vmem>>, vector<1x8xf32>
    %39 = vector.broadcast %38 : vector<1x8xf32> to vector<32x8xf32>
    %40 = arith.addf %37, %39 : vector<32x8xf32>
    %cst_43 = arith.constant 0.000000e+00 : f32
    %41 = vector.broadcast %cst_43 : f32 to vector<32x8xf32>
    %42 = arith.maximumf %40, %41 : vector<32x8xf32>
    %c1_44 = arith.constant 1 : index
    %c0_45 = arith.constant 0 : index
    %43 = vector.load %arg19[%c1_44, %c0_45] : memref<40x8xf32, #tpu.memory_space<vmem>>, vector<32x8xf32>
    tpu.vector_store %arg19[%c1_44, %c0_45], %42 {strides = array<i32>} : memref<40x8xf32, #tpu.memory_space<vmem>>, vector<32x8xf32>,
    %c0_46 = arith.constant 0 : index
    %c0_47 = arith.constant 0 : index
    %44 = tpu.strided_load %arg19[%c0_46, %c0_47] {strides = array<i32: 2, 1>} : memref<40x8xf32, #tpu.memory_space<vmem>>, vector<16x8xf32>
    %45 = arith.truncf %44 : vector<16x8xf32> to vector<16x8xbf16>
    %c0_48 = arith.constant 0 : index
    %c0_49 = arith.constant 0 : index
    %c0_50 = arith.constant 0 : index
    %46 = vector.load %arg5[%c0_48, %c0_49, %c0_50] : memref<3x8x16xbf16, #tpu.memory_space<vmem>>, vector<1x8x16xbf16>
    %47 = vector.shape_cast %46 : vector<1x8x16xbf16> to vector<8x16xbf16>
    %cst_51 = arith.constant dense<0.000000e+00> : vector<16x16xf32>
    %48 = tpu.matmul %45, %47, %cst_51 {dimension_numbers = #tpu.dot_dimension_numbers<[1], [0], [0], [1], [0, 0, 1, 1], [], []>} : vector<16x8xbf16>, vector<8x16xbf16>, vector<16x16xf32> -> vector<16x16xf32>
    %c1_52 = arith.constant 1 : index
    %c0_53 = arith.constant 0 : index
    %49 = tpu.strided_load %arg19[%c1_52, %c0_53] {strides = array<i32: 2, 1>} : memref<40x8xf32, #tpu.memory_space<vmem>>, vector<16x8xf32>
    %50 = arith.truncf %49 : vector<16x8xf32> to vector<16x8xbf16>
    %c1_54 = arith.constant 1 : index
    %c0_55 = arith.constant 0 : index
    %c0_56 = arith.constant 0 : index
    %51 = vector.load %arg5[%c1_54, %c0_55, %c0_56] : memref<3x8x16xbf16, #tpu.memory_space<vmem>>, vector<1x8x16xbf16>
    %52 = vector.shape_cast %51 : vector<1x8x16xbf16> to vector<8x16xbf16>
    %cst_57 = arith.constant dense<0.000000e+00> : vector<16x16xf32>
    %53 = tpu.matmul %50, %52, %cst_57 {dimension_numbers = #tpu.dot_dimension_numbers<[1], [0], [0], [1], [0, 0, 1, 1], [], []>} : vector<16x8xbf16>, vector<8x16xbf16>, vector<16x16xf32> -> vector<16x16xf32>
    %54 = arith.addf %48, %53 : vector<16x16xf32>
    %c2_58 = arith.constant 2 : index
    %c0_59 = arith.constant 0 : index
    %55 = tpu.strided_load %arg19[%c2_58, %c0_59] {strides = array<i32: 2, 1>} : memref<40x8xf32, #tpu.memory_space<vmem>>, vector<16x8xf32>
    %56 = arith.truncf %55 : vector<16x8xf32> to vector<16x8xbf16>
    %c2_60 = arith.constant 2 : index
    %c0_61 = arith.constant 0 : index
    %c0_62 = arith.constant 0 : index
    %57 = vector.load %arg5[%c2_60, %c0_61, %c0_62] : memref<3x8x16xbf16, #tpu.memory_space<vmem>>, vector<1x8x16xbf16>
    %58 = vector.shape_cast %57 : vector<1x8x16xbf16> to vector<8x16xbf16>
    %cst_63 = arith.constant dense<0.000000e+00> : vector<16x16xf32>
    %59 = tpu.matmul %56, %58, %cst_63 {dimension_numbers = #tpu.dot_dimension_numbers<[1], [0], [0], [1], [0, 0, 1, 1], [], []>} : vector<16x8xbf16>, vector<8x16xbf16>, vector<16x16xf32> -> vector<16x16xf32>
    %60 = arith.addf %54, %59 : vector<16x16xf32>
    %c0_64 = arith.constant 0 : index
    %c0_65 = arith.constant 0 : index
    %61 = vector.load %arg6[%c0_64, %c0_65] : memref<1x16xf32, #tpu.memory_space<vmem>>, vector<1x16xf32>
    %62 = vector.broadcast %61 : vector<1x16xf32> to vector<16x16xf32>
    %63 = arith.mulf %60, %62 : vector<16x16xf32>
    %c0_66 = arith.constant 0 : index
    %c0_67 = arith.constant 0 : index
    %64 = vector.load %arg7[%c0_66, %c0_67] : memref<1x16xf32, #tpu.memory_space<vmem>>, vector<1x16xf32>
    %65 = vector.broadcast %64 : vector<1x16xf32> to vector<16x16xf32>
    %66 = arith.addf %63, %65 : vector<16x16xf32>
    %cst_68 = arith.constant 0.000000e+00 : f32
    %67 = vector.broadcast %cst_68 : f32 to vector<16x16xf32>
    %68 = arith.maximumf %66, %67 : vector<16x16xf32>
    %c1_69 = arith.constant 1 : index
    %c0_70 = arith.constant 0 : index
    %69 = vector.load %arg20[%c1_69, %c0_70] : memref<24x16xf32, #tpu.memory_space<vmem>>, vector<16x16xf32>
    tpu.vector_store %arg20[%c1_69, %c0_70], %68 {strides = array<i32>} : memref<24x16xf32, #tpu.memory_space<vmem>>, vector<16x16xf32>,
    %c0_71 = arith.constant 0 : index
    %c0_72 = arith.constant 0 : index
    %70 = tpu.strided_load %arg20[%c0_71, %c0_72] {strides = array<i32: 2, 1>} : memref<24x16xf32, #tpu.memory_space<vmem>>, vector<8x16xf32>
    %71 = arith.truncf %70 : vector<8x16xf32> to vector<8x16xbf16>
    %c0_73 = arith.constant 0 : index
    %c0_74 = arith.constant 0 : index
    %c0_75 = arith.constant 0 : index
    %72 = vector.load %arg8[%c0_73, %c0_74, %c0_75] : memref<3x16x16xbf16, #tpu.memory_space<vmem>>, vector<1x16x16xbf16>
    %73 = vector.shape_cast %72 : vector<1x16x16xbf16> to vector<16x16xbf16>
    %cst_76 = arith.constant dense<0.000000e+00> : vector<8x16xf32>
    %74 = tpu.matmul %71, %73, %cst_76 {dimension_numbers = #tpu.dot_dimension_numbers<[1], [0], [0], [1], [0, 0, 1, 1], [], []>} : vector<8x16xbf16>, vector<16x16xbf16>, vector<8x16xf32> -> vector<8x16xf32>
    %c1_77 = arith.constant 1 : index
    %c0_78 = arith.constant 0 : index
    %75 = tpu.strided_load %arg20[%c1_77, %c0_78] {strides = array<i32: 2, 1>} : memref<24x16xf32, #tpu.memory_space<vmem>>, vector<8x16xf32>
    %76 = arith.truncf %75 : vector<8x16xf32> to vector<8x16xbf16>
    %c1_79 = arith.constant 1 : index
    %c0_80 = arith.constant 0 : index
    %c0_81 = arith.constant 0 : index
    %77 = vector.load %arg8[%c1_79, %c0_80, %c0_81] : memref<3x16x16xbf16, #tpu.memory_space<vmem>>, vector<1x16x16xbf16>
    %78 = vector.shape_cast %77 : vector<1x16x16xbf16> to vector<16x16xbf16>
    %cst_82 = arith.constant dense<0.000000e+00> : vector<8x16xf32>
    %79 = tpu.matmul %76, %78, %cst_82 {dimension_numbers = #tpu.dot_dimension_numbers<[1], [0], [0], [1], [0, 0, 1, 1], [], []>} : vector<8x16xbf16>, vector<16x16xbf16>, vector<8x16xf32> -> vector<8x16xf32>
    %80 = arith.addf %74, %79 : vector<8x16xf32>
    %c2_83 = arith.constant 2 : index
    %c0_84 = arith.constant 0 : index
    %81 = tpu.strided_load %arg20[%c2_83, %c0_84] {strides = array<i32: 2, 1>} : memref<24x16xf32, #tpu.memory_space<vmem>>, vector<8x16xf32>
    %82 = arith.truncf %81 : vector<8x16xf32> to vector<8x16xbf16>
    %c2_85 = arith.constant 2 : index
    %c0_86 = arith.constant 0 : index
    %c0_87 = arith.constant 0 : index
    %83 = vector.load %arg8[%c2_85, %c0_86, %c0_87] : memref<3x16x16xbf16, #tpu.memory_space<vmem>>, vector<1x16x16xbf16>
    %84 = vector.shape_cast %83 : vector<1x16x16xbf16> to vector<16x16xbf16>
    %cst_88 = arith.constant dense<0.000000e+00> : vector<8x16xf32>
    %85 = tpu.matmul %82, %84, %cst_88 {dimension_numbers = #tpu.dot_dimension_numbers<[1], [0], [0], [1], [0, 0, 1, 1], [], []>} : vector<8x16xbf16>, vector<16x16xbf16>, vector<8x16xf32> -> vector<8x16xf32>
    %86 = arith.addf %80, %85 : vector<8x16xf32>
    %c0_89 = arith.constant 0 : index
    %c0_90 = arith.constant 0 : index
    %87 = vector.load %arg9[%c0_89, %c0_90] : memref<1x16xf32, #tpu.memory_space<vmem>>, vector<1x16xf32>
    %88 = vector.broadcast %87 : vector<1x16xf32> to vector<8x16xf32>
    %89 = arith.mulf %86, %88 : vector<8x16xf32>
    %c0_91 = arith.constant 0 : index
    %c0_92 = arith.constant 0 : index
    %90 = vector.load %arg10[%c0_91, %c0_92] : memref<1x16xf32, #tpu.memory_space<vmem>>, vector<1x16xf32>
    %91 = vector.broadcast %90 : vector<1x16xf32> to vector<8x16xf32>
    %92 = arith.addf %89, %91 : vector<8x16xf32>
    %cst_93 = arith.constant 0.000000e+00 : f32
    %93 = vector.broadcast %cst_93 : f32 to vector<8x16xf32>
    %94 = arith.maximumf %92, %93 : vector<8x16xf32>
    %c1_94 = arith.constant 1 : index
    %c0_95 = arith.constant 0 : index
    %95 = vector.load %arg21[%c1_94, %c0_95] : memref<16x16xf32, #tpu.memory_space<vmem>>, vector<8x16xf32>
    tpu.vector_store %arg21[%c1_94, %c0_95], %94 {strides = array<i32>} : memref<16x16xf32, #tpu.memory_space<vmem>>, vector<8x16xf32>,
    %c0_96 = arith.constant 0 : index
    %c0_97 = arith.constant 0 : index
    %96 = tpu.strided_load %arg21[%c0_96, %c0_97] {strides = array<i32: 2, 1>} : memref<16x16xf32, #tpu.memory_space<vmem>>, vector<4x16xf32>
    %97 = arith.truncf %96 : vector<4x16xf32> to vector<4x16xbf16>
    %c0_98 = arith.constant 0 : index
    %c0_99 = arith.constant 0 : index
    %c0_100 = arith.constant 0 : index
    %98 = vector.load %arg11[%c0_98, %c0_99, %c0_100] : memref<3x16x32xbf16, #tpu.memory_space<vmem>>, vector<1x16x32xbf16>
    %99 = vector.shape_cast %98 : vector<1x16x32xbf16> to vector<16x32xbf16>
    %cst_101 = arith.constant dense<0.000000e+00> : vector<4x32xf32>
    %100 = tpu.matmul %97, %99, %cst_101 {dimension_numbers = #tpu.dot_dimension_numbers<[1], [0], [0], [1], [0, 0, 1, 1], [], []>} : vector<4x16xbf16>, vector<16x32xbf16>, vector<4x32xf32> -> vector<4x32xf32>
    %c1_102 = arith.constant 1 : index
    %c0_103 = arith.constant 0 : index
    %101 = tpu.strided_load %arg21[%c1_102, %c0_103] {strides = array<i32: 2, 1>} : memref<16x16xf32, #tpu.memory_space<vmem>>, vector<4x16xf32>
    %102 = arith.truncf %101 : vector<4x16xf32> to vector<4x16xbf16>
    %c1_104 = arith.constant 1 : index
    %c0_105 = arith.constant 0 : index
    %c0_106 = arith.constant 0 : index
    %103 = vector.load %arg11[%c1_104, %c0_105, %c0_106] : memref<3x16x32xbf16, #tpu.memory_space<vmem>>, vector<1x16x32xbf16>
    %104 = vector.shape_cast %103 : vector<1x16x32xbf16> to vector<16x32xbf16>
    %cst_107 = arith.constant dense<0.000000e+00> : vector<4x32xf32>
    %105 = tpu.matmul %102, %104, %cst_107 {dimension_numbers = #tpu.dot_dimension_numbers<[1], [0], [0], [1], [0, 0, 1, 1], [], []>} : vector<4x16xbf16>, vector<16x32xbf16>, vector<4x32xf32> -> vector<4x32xf32>
    %106 = arith.addf %100, %105 : vector<4x32xf32>
    %c2_108 = arith.constant 2 : index
    %c0_109 = arith.constant 0 : index
    %107 = tpu.strided_load %arg21[%c2_108, %c0_109] {strides = array<i32: 2, 1>} : memref<16x16xf32, #tpu.memory_space<vmem>>, vector<4x16xf32>
    %108 = arith.truncf %107 : vector<4x16xf32> to vector<4x16xbf16>
    %c2_110 = arith.constant 2 : index
    %c0_111 = arith.constant 0 : index
    %c0_112 = arith.constant 0 : index
    %109 = vector.load %arg11[%c2_110, %c0_111, %c0_112] : memref<3x16x32xbf16, #tpu.memory_space<vmem>>, vector<1x16x32xbf16>
    %110 = vector.shape_cast %109 : vector<1x16x32xbf16> to vector<16x32xbf16>
    %cst_113 = arith.constant dense<0.000000e+00> : vector<4x32xf32>
    %111 = tpu.matmul %108, %110, %cst_113 {dimension_numbers = #tpu.dot_dimension_numbers<[1], [0], [0], [1], [0, 0, 1, 1], [], []>} : vector<4x16xbf16>, vector<16x32xbf16>, vector<4x32xf32> -> vector<4x32xf32>
    %112 = arith.addf %106, %111 : vector<4x32xf32>
    %c0_114 = arith.constant 0 : index
    %c0_115 = arith.constant 0 : index
    %113 = vector.load %arg12[%c0_114, %c0_115] : memref<1x32xf32, #tpu.memory_space<vmem>>, vector<1x32xf32>
    %114 = vector.broadcast %113 : vector<1x32xf32> to vector<4x32xf32>
    %115 = arith.mulf %112, %114 : vector<4x32xf32>
    %c0_116 = arith.constant 0 : index
    %c0_117 = arith.constant 0 : index
    %116 = vector.load %arg13[%c0_116, %c0_117] : memref<1x32xf32, #tpu.memory_space<vmem>>, vector<1x32xf32>
    %117 = vector.broadcast %116 : vector<1x32xf32> to vector<4x32xf32>
    %118 = arith.addf %115, %117 : vector<4x32xf32>
    %cst_118 = arith.constant 0.000000e+00 : f32
    %119 = vector.broadcast %cst_118 : f32 to vector<4x32xf32>
    %120 = arith.maximumf %118, %119 : vector<4x32xf32>
    %c1_119 = arith.constant 1 : index
    %c0_120 = arith.constant 0 : index
    %121 = vector.load %arg22[%c1_119, %c0_120] : memref<8x32xf32, #tpu.memory_space<vmem>>, vector<4x32xf32>
    tpu.vector_store %arg22[%c1_119, %c0_120], %120 {strides = array<i32>} : memref<8x32xf32, #tpu.memory_space<vmem>>, vector<4x32xf32>,
    %c0_121 = arith.constant 0 : index
    %c0_122 = arith.constant 0 : index
    %122 = tpu.strided_load %arg22[%c0_121, %c0_122] {strides = array<i32: 2, 1>} : memref<8x32xf32, #tpu.memory_space<vmem>>, vector<2x32xf32>
    %123 = arith.truncf %122 : vector<2x32xf32> to vector<2x32xbf16>
    %c0_123 = arith.constant 0 : index
    %c0_124 = arith.constant 0 : index
    %c0_125 = arith.constant 0 : index
    %124 = vector.load %arg14[%c0_123, %c0_124, %c0_125] : memref<3x32x32xbf16, #tpu.memory_space<vmem>>, vector<1x32x32xbf16>
    %125 = vector.shape_cast %124 : vector<1x32x32xbf16> to vector<32x32xbf16>
    %cst_126 = arith.constant dense<0.000000e+00> : vector<2x32xf32>
    %126 = tpu.matmul %123, %125, %cst_126 {dimension_numbers = #tpu.dot_dimension_numbers<[1], [0], [0], [1], [0, 0, 1, 1], [], []>} : vector<2x32xbf16>, vector<32x32xbf16>, vector<2x32xf32> -> vector<2x32xf32>
    %c1_127 = arith.constant 1 : index
    %c0_128 = arith.constant 0 : index
    %127 = tpu.strided_load %arg22[%c1_127, %c0_128] {strides = array<i32: 2, 1>} : memref<8x32xf32, #tpu.memory_space<vmem>>, vector<2x32xf32>
    %128 = arith.truncf %127 : vector<2x32xf32> to vector<2x32xbf16>
    %c1_129 = arith.constant 1 : index
    %c0_130 = arith.constant 0 : index
    %c0_131 = arith.constant 0 : index
    %129 = vector.load %arg14[%c1_129, %c0_130, %c0_131] : memref<3x32x32xbf16, #tpu.memory_space<vmem>>, vector<1x32x32xbf16>
    %130 = vector.shape_cast %129 : vector<1x32x32xbf16> to vector<32x32xbf16>
    %cst_132 = arith.constant dense<0.000000e+00> : vector<2x32xf32>
    %131 = tpu.matmul %128, %130, %cst_132 {dimension_numbers = #tpu.dot_dimension_numbers<[1], [0], [0], [1], [0, 0, 1, 1], [], []>} : vector<2x32xbf16>, vector<32x32xbf16>, vector<2x32xf32> -> vector<2x32xf32>
    %132 = arith.addf %126, %131 : vector<2x32xf32>
    %c2_133 = arith.constant 2 : index
    %c0_134 = arith.constant 0 : index
    %133 = tpu.strided_load %arg22[%c2_133, %c0_134] {strides = array<i32: 2, 1>} : memref<8x32xf32, #tpu.memory_space<vmem>>, vector<2x32xf32>
    %134 = arith.truncf %133 : vector<2x32xf32> to vector<2x32xbf16>
    %c2_135 = arith.constant 2 : index
    %c0_136 = arith.constant 0 : index
    %c0_137 = arith.constant 0 : index
    %135 = vector.load %arg14[%c2_135, %c0_136, %c0_137] : memref<3x32x32xbf16, #tpu.memory_space<vmem>>, vector<1x32x32xbf16>
    %136 = vector.shape_cast %135 : vector<1x32x32xbf16> to vector<32x32xbf16>
    %cst_138 = arith.constant dense<0.000000e+00> : vector<2x32xf32>
    %137 = tpu.matmul %134, %136, %cst_138 {dimension_numbers = #tpu.dot_dimension_numbers<[1], [0], [0], [1], [0, 0, 1, 1], [], []>} : vector<2x32xbf16>, vector<32x32xbf16>, vector<2x32xf32> -> vector<2x32xf32>
    %138 = arith.addf %132, %137 : vector<2x32xf32>
    %c0_139 = arith.constant 0 : index
    %c0_140 = arith.constant 0 : index
    %139 = vector.load %arg15[%c0_139, %c0_140] : memref<1x32xf32, #tpu.memory_space<vmem>>, vector<1x32xf32>
    %140 = vector.broadcast %139 : vector<1x32xf32> to vector<2x32xf32>
    %141 = arith.mulf %138, %140 : vector<2x32xf32>
    %c0_141 = arith.constant 0 : index
    %c0_142 = arith.constant 0 : index
    %142 = vector.load %arg16[%c0_141, %c0_142] : memref<1x32xf32, #tpu.memory_space<vmem>>, vector<1x32xf32>
    %143 = vector.broadcast %142 : vector<1x32xf32> to vector<2x32xf32>
    %144 = arith.addf %141, %143 : vector<2x32xf32>
    %cst_143 = arith.constant dense<0.000000e+00> : vector<32xf32>
    %145 = vector.multi_reduction <add>, %144, %cst_143 [0] : vector<2x32xf32> to vector<32xf32>
    %cst_144 = arith.constant 2.000000e+00 : f32
    %146 = vector.broadcast %cst_144 : f32 to vector<32xf32>
    %147 = arith.divf %145, %146 : vector<32xf32>
    %148 = vector.shape_cast %147 : vector<32xf32> to vector<1x1x32xf32>
    %c0_145 = arith.constant 0 : index
    %c0_146 = arith.constant 0 : index
    %c0_147 = arith.constant 0 : index
    %149 = vector.load %arg17[%c0_145, %c0_146, %c0_147] : memref<1x1x32xf32, #tpu.memory_space<vmem>>, vector<1x1x32xf32>
    tpu.vector_store %arg17[%c0_145, %c0_146, %c0_147], %148 {strides = array<i32>} : memref<1x1x32xf32, #tpu.memory_space<vmem>>, vector<1x1x32xf32>,
    return
  }
  func.func @transform_0(%arg0: i32) -> (i32, i32, i32) {
    %c0_i32 = arith.constant 0 : i32
    %c0_i32_0 = arith.constant 0 : i32
    %c0_i32_1 = arith.constant 0 : i32
    return %arg0, %c0_i32, %c0_i32_0 : i32, i32, i32
  }
  func.func @transform_1(%arg0: i32) -> (i32, i32, i32) {
    %c0_i32 = arith.constant 0 : i32
    %c0_i32_0 = arith.constant 0 : i32
    %c0_i32_1 = arith.constant 0 : i32
    %c0_i32_2 = arith.constant 0 : i32
    return %c0_i32, %c0_i32_0, %c0_i32_1 : i32, i32, i32
  }
  func.func @transform_2(%arg0: i32) -> (i32, i32) {
    %c0_i32 = arith.constant 0 : i32
    %c0_i32_0 = arith.constant 0 : i32
    %c0_i32_1 = arith.constant 0 : i32
    return %c0_i32, %c0_i32_0 : i32, i32
  }
  func.func @transform_3(%arg0: i32) -> (i32, i32) {
    %c0_i32 = arith.constant 0 : i32
    %c0_i32_0 = arith.constant 0 : i32
    %c0_i32_1 = arith.constant 0 : i32
    return %c0_i32, %c0_i32_0 : i32, i32
  }
  func.func @transform_4(%arg0: i32) -> (i32, i32, i32) {
    %c0_i32 = arith.constant 0 : i32
    %c0_i32_0 = arith.constant 0 : i32
    %c0_i32_1 = arith.constant 0 : i32
    %c0_i32_2 = arith.constant 0 : i32
    return %c0_i32, %c0_i32_0, %c0_i32_1 : i32, i32, i32
  }
  func.func @transform_5(%arg0: i32) -> (i32, i32) {
    %c0_i32 = arith.constant 0 : i32
    %c0_i32_0 = arith.constant 0 : i32
    %c0_i32_1 = arith.constant 0 : i32
    return %c0_i32, %c0_i32_0 : i32, i32
  }
  func.func @transform_6(%arg0: i32) -> (i32, i32) {
    %c0_i32 = arith.constant 0 : i32
    %c0_i32_0 = arith.constant 0 : i32
    %c0_i32_1 = arith.constant 0 : i32
    return %c0_i32, %c0_i32_0 : i32, i32
  }
  func.func @transform_7(%arg0: i32) -> (i32, i32, i32) {
    %c0_i32 = arith.constant 0 : i32
    %c0_i32_0 = arith.constant 0 : i32
    %c0_i32_1 = arith.constant 0 : i32
    %c0_i32_2 = arith.constant 0 : i32
    return %c0_i32, %c0_i32_0, %c0_i32_1 : i32, i32, i32
  }
  func.func @transform_8(%arg0: i32) -> (i32, i32) {
    %c0_i32 = arith.constant 0 : i32
    %c0_i32_0 = arith.constant 0 : i32
    %c0_i32_1 = arith.constant 0 : i32
    return %c0_i32, %c0_i32_0 : i32, i32
  }
  func.func @transform_9(%arg0: i32) -> (i32, i32) {
    %c0_i32 = arith.constant 0 : i32
    %c0_i32_0 = arith.constant 0 : i32
    %c0_i32_1 = arith.constant 0 : i32
    return %c0_i32, %c0_i32_0 : i32, i32
  }
  func.func @transform_10(%arg0: i32) -> (i32, i32, i32) {
    %c0_i32 = arith.constant 0 : i32
    %c0_i32_0 = arith.constant 0 : i32
    %c0_i32_1 = arith.constant 0 : i32
    %c0_i32_2 = arith.constant 0 : i32
    return %c0_i32, %c0_i32_0, %c0_i32_1 : i32, i32, i32
  }
  func.func @transform_11(%arg0: i32) -> (i32, i32) {
    %c0_i32 = arith.constant 0 : i32
    %c0_i32_0 = arith.constant 0 : i32
    %c0_i32_1 = arith.constant 0 : i32
    return %c0_i32, %c0_i32_0 : i32, i32
  }
  func.func @transform_12(%arg0: i32) -> (i32, i32) {
    %c0_i32 = arith.constant 0 : i32
    %c0_i32_0 = arith.constant 0 : i32
    %c0_i32_1 = arith.constant 0 : i32
    return %c0_i32, %c0_i32_0 : i32, i32
  }
  func.func @transform_13(%arg0: i32) -> (i32, i32, i32) {
    %c0_i32 = arith.constant 0 : i32
    %c0_i32_0 = arith.constant 0 : i32
    %c0_i32_1 = arith.constant 0 : i32
    %c0_i32_2 = arith.constant 0 : i32
    return %c0_i32, %c0_i32_0, %c0_i32_1 : i32, i32, i32
  }
  func.func @transform_14(%arg0: i32) -> (i32, i32) {
    %c0_i32 = arith.constant 0 : i32
    %c0_i32_0 = arith.constant 0 : i32
    %c0_i32_1 = arith.constant 0 : i32
    return %c0_i32, %c0_i32_0 : i32, i32
  }
  func.func @transform_15(%arg0: i32) -> (i32, i32) {
    %c0_i32 = arith.constant 0 : i32
    %c0_i32_0 = arith.constant 0 : i32
    %c0_i32_1 = arith.constant 0 : i32
    return %c0_i32, %c0_i32_0 : i32, i32
  }
  func.func @transform_16(%arg0: i32) -> (i32, i32, i32) {
    %c0_i32 = arith.constant 0 : i32
    %c0_i32_0 = arith.constant 0 : i32
    %c0_i32_1 = arith.constant 0 : i32
    return %arg0, %c0_i32, %c0_i32_0 : i32, i32, i32
  }
}

</mosaic_0001>

<bundles_post_ra>
// kernel: tpu_custom_call.1
= control target key start
LH: loop header
LB: loop body
LE: loop exit
PB: predicated region body
PF: predicated region fallthrough
CT: control target
= control target key end

     0   :  { %s2352_s0 = inlined_call_operand.vmem [shape: f32[2,64,4], index: 0, kind: input, shape index: {}]   ;;  %s2353_s1 = inlined_call_operand.vmem [shape: bf16[3,4,8], index: 1, kind: input, shape index: {}]   ;;  %s2354_s2 = inlined_call_operand.vmem [shape: f32[1,8], index: 2, kind: input, shape index: {}]   ;;  %s2355_s3 = inlined_call_operand.vmem [shape: f32[1,8], index: 3, kind: input, shape index: {}]   ;;  %s2356_s4 = inlined_call_operand.vmem [shape: bf16[3,8,16], index: 4, kind: input, shape index: {}]   ;;  %s2357_s5 = inlined_call_operand.vmem [shape: f32[1,16], index: 5, kind: input, shape index: {}]   ;;  %s2358_s6 = inlined_call_operand.vmem [shape: f32[1,16], index: 6, kind: input, shape index: {}]   ;;  %s2359_s7 = inlined_call_operand.vmem [shape: bf16[3,16,16], index: 7, kind: input, shape index: {}]   ;;  %s2360_s8 = inlined_call_operand.vmem [shape: f32[1,16], index: 8, kind: input, shape index: {}]   ;;  %s2361_s9 = inlined_call_operand.vmem [shape: f32[1,16], index: 9, kind: input, shape index: {}]   ;;  %s2362_s10 = inlined_call_operand.vmem [shape: bf16[3,16,32], index: 10, kind: input, shape index: {}]   ;;  %s2363_s11 = inlined_call_operand.vmem [shape: f32[1,32], index: 11, kind: input, shape index: {}]   ;;  %s2364_s12 = inlined_call_operand.vmem [shape: f32[1,32], index: 12, kind: input, shape index: {}]   ;;  %s2365_s13 = inlined_call_operand.vmem [shape: bf16[3,32,32], index: 13, kind: input, shape index: {}]   ;;  %s2366_s14 = inlined_call_operand.vmem [shape: f32[1,32], index: 14, kind: input, shape index: {}]   ;;  %s2367_s15 = inlined_call_operand.vmem [shape: f32[1,32], index: 15, kind: input, shape index: {}]   ;;  %s2368_s16 = inlined_call_operand.hbm [shape: f32[2,1,32], index: 16, kind: output, shape index: {}]  }
   0x1   :  { %2370 = sst [smem:[#allocation12_spill]] %s2352_s0 }
   0x2   :  { %2371 = sst [smem:[#allocation13_spill]] %s2353_s1 }
   0x3   :  { %2372 = sst [smem:[#allocation14_spill]] %s2354_s2 }
   0x4   :  { %2373 = sst [smem:[#allocation15_spill]] %s2355_s3 }
   0x5   :  { %21 = vsyncpa [#allocation8], 0 }
   0x6   :  { %23 = vsyncpa [#allocation8 + $0x1], 0  ;;  %s2080_s21 = smov 0   ;;  %s2082_s22 = smov 0  }
   0x7   :  { %s2084_s23 = smov 0   ;;  %s2086_s24 = smov 0  }
   0x8 LB: > { %2374 = sst [smem:[#allocation10_spill]] %s1986_s23  ;;  %s2101_s25 = sadd.s32 4294967295, %s1990_s24   ;;  %s1990_s24 = sphi %s2086_s24, %s2386_s24   ;;  %s1986_s23 = sphi %s2084_s23, %s2383_s23   ;;  %s1982_s22 = sphi %s2082_s22, %s2385_s22   ;;  %s1978_s21 = sphi %s2080_s21, %s2384_s21  }
   0x9   : > { %s1630_s26 = sadd.s32 4294967294, %s1990_s24   ;;  %s2105_s27 = sadd.s32 1, %s1990_s24  }
   0xa   : > { %s377_s28 = sadd.s32 1, %s1986_s23  ;;  %s374_s29 = ssub.s32 %s1990_s24, %s2105_s27 }
   0xb   : > { %p387_p0 = scmp.ne.s32.totalorder %s1986_s23, %s1982_s22  ;;  %p375_p1 = scmp.eq.s32.totalorder %s374_s29, 0 }
   0xc   : > { %p388_p2 = scmp.eq.s32.totalorder %s2101_s25, 1  ;;  %p393_p3 = scmp.ne.s32.totalorder %s1982_s22, %s1978_s21 }
   0xd   : > { %p394_p4 = scmp.eq.s32.totalorder %s1630_s26, 1  ;;  %p1633_p7 = scmp.ge.s32.totalorder %s1990_s24, 1 }
   0xe   : > { %s2116_s30 = scalar_select %p375_p1, %s1986_s23, %s377_s28  }
   0xf   : > { %p2118_p5 = por %p388_p2, %p387_p0  ;;  %p2122_p6 = por %p394_p4, %p393_p3 }
  0x10   : > { %2375 = sst [smem:[#allocation11_spill]] %s2116_s30  ;;  %p465_p8 = scmp.lt.s32.totalorder %s1990_s24, 3 }
  0x12   : > { %p466_p9 = pnand %p1633_p7, %p465_p8 }
  0x13   : > { %s2378_s1 = sld [smem:[#allocation13_spill]] (!%p466_p9)  ;;  %vm579_vm0 = vcmask (!%p466_p9), 1041408   ;;  %p514_p10 = scmp.lt.s32.totalorder (!%p466_p9), %s2101_s25, 1  ;;  %vm520_vm1 = vcmask (!%p466_p9), 24576   ;;  %v1992_v2 = vmov (!%p466_p9), 0.0   ;;  %vm542_vm2 = vcmask (!%p466_p9), 31744  }
  0x14   : > { %469 = sbr.rel (%p466_p9) target bundleno = 1317 (0x525), region = 84  ;;  %521 = vst.msk [vmem:[#allocation2] sm:$0x1] (!%p466_p9), %vm520_vm1, %v1992_v2  ;;  %s2379_s26 = sld [smem:[#allocation12_spill]] (!%p466_p9)  ;;  %vm523_vm3 = vcmask (!%p466_p9), 57344   ;;  %vm810_vm4 = vcmask (!%p466_p9), 1043456  }
  0x15   : > { %v1646_v33 = vld [vmem:[%s2356_s4 + $0x4] sm:$0xf] (!%p466_p9)  ;;  %524 = vst.msk [vmem:[#allocation3] sm:$0x1] (!%p466_p9), %vm523_vm3, %v1992_v2  ;;  %vm1993_vm5 = vmmov (!%p466_p9), 0   ;;  %s2380_s2 = sld [smem:[#allocation14_spill]] (!%p466_p9) }
  0x16   : > { %v812_v34 = vsel (!%p466_p9), %vm810_vm4, %v1646_v33, 0  ;;  %s2381_s3 = sld [smem:[#allocation15_spill]] (!%p466_p9)  ;;  %vm790_vm6 = vcmask (!%p466_p9), 64512   ;;  %v799_v61 = vld [vmem:[%s2356_s4] sm:$0xf] (!%p466_p9)  ;;  %vm526_vm7 = vcmask (!%p466_p9), 122880  }
  0x17   : > { %527 = vst.msk [vmem:[#allocation4] sm:$0x1] (!%p466_p9), %vm526_vm7, %v1992_v2  ;;  %529 = vst.msk [vmem:[#allocation5] sm:$0x1] (!%p466_p9), %vm526_vm7, %v1992_v2  ;;  %vm978_vm8 = vcmask (!%p466_p9), 130048   ;;  %vm531_vm9 = vcmask (!%p466_p9), 253952  }
  0x18   : > { %v1663_v33 = vld [vmem:[%s2360_s8] ss:$0 sm:$0xff] (!%p466_p9)  ;;  %532 = vst.msk [vmem:[#allocation6] sm:$0x1] (!%p466_p9), %vm531_vm9, %v1992_v2  ;;  %vm1344_vm10 = vcmask (!%p466_p9), 257024   ;;  %vm1372_vm11 = vcmask (!%p466_p9), 261120  }
  0x19   : > { %v560_v0 = vld [vmem:[%s2378_s1] sm:$0x3] (!%p466_p9)  ;;  %v1641_v3 = vld [vmem:[%s2378_s1 + $0x4] sm:$0x3] (!%p466_p9)  ;;  %v1636_v4 = vld [vmem:[%s2378_s1 + $0x2] sm:$0x3] (!%p466_p9) }
  0x1a   : > { %1873 = vmatprep.subr.msk.bf16.mxu0 (!%p466_p9), %vm579_vm0, %v560_v0  ;;  %v639_v1 = vsel (!%p466_p9), %vm579_vm0, %v560_v0, 0  ;;  %1872 = vmatprep.subr.msk.bf16.mxu1 (!%p466_p9), %vm579_vm0, %v1636_v4  ;;  %v581_v5 = vsel (!%p466_p9), %vm579_vm0, %v1636_v4, 0  ;;  %v709_v26 = vsel (!%p466_p9), %vm579_vm0, %v1641_v3, 0  ;;  %vm1551_vm12 = vcmask (!%p466_p9), 254976   ;;  %s512_s28 = sand.u32 (!%p466_p9), 1, %s1982_s22   ;;  %s1696_s29 = sshll.u32 (!%p466_p9), %s2101_s25, 4 }
  0x1b   : > { %1743 = vmatpush3.bf16.msra.mxu0 %v639_v1  ;;  %s515_s18 = scalar_select %p514_p10, %s2101_s25, 1  ;;  %1737 = vmatpush3.bf16.msra.mxu1 %v581_v5  ;;  %v1644_v40 = vld [vmem:[%s2380_s2] ss:$0 sm:$0xff]  ;;  %v859_v1 = vsel %vm810_vm4, %v799_v61, 0  ;;  %v1649_v5 = vld [vmem:[%s2356_s4 + $0x8] sm:$0xf] }
  0x1c   : > { %1874 = vmatprep.subr.msk.bf16.mxu0 %vm579_vm0, %v1641_v3  ;;  %1754 = vmatprep.subr.bf16.mxu1 %v1992_v2  ;;  %v1645_v43 = vld [vmem:[%s2381_s3] ss:$0 sm:$0xff]  ;;  %s1563_s30 = scalar_lea.sflag [#allocation8], %s512_s28  ;;  %s1994_s25 = smov [#allocation7]  }
  0x1d   : > { %s1699_s19 = sshll.u32 %s515_s18, 6  ;;  %s513_s18 = scalar_lea.vmem [#allocation7], %s512_s28 }
  0x1e   : > { %s518_s23 = scalar_lea.vmem %s2379_s26, %s1699_s19  ;;  %s1575_s19 = sshll.u32 %s513_s18, 4  ;;  %s2311_s19 = int_to_ptr.vmem [resolvable:$true] %s1575_s19 }
  0x1f   : > { %v534_v6 = vld [vmem:[%s518_s23] sm:$0xff]  ;;  %v535_v7 = vld [vmem:[%s518_s23 + $0x8] sm:$0xff]  ;;  %v536_v8 = vld [vmem:[%s518_s23 + $0x10] sm:$0xff]  ;;  %s1928_s1 = scalar_lea.vmem %s2311_s19, 16  ;;  %s1932_s2 = sshll.u32 %s1994_s25, 4  ;;  %s1933_s2 = int_to_ptr.vmem [resolvable:$false] %s1932_s2 }
  0x20   : > { %v537_v9 = vld [vmem:[%s518_s23 + $0x18] sm:$0xff]  ;;  %543 = vst.msk [vmem:[#allocation2 + $0x1] sm:$0xff] %vm542_vm2, %v534_v6  ;;  %544 = vst.msk [vmem:[#allocation2 + $0x9] sm:$0xff] %vm542_vm2, %v535_v7  ;;  %v538_v10 = vld [vmem:[%s518_s23 + $0x20] sm:$0xff]  ;;  %v913_v7 = vsel %vm810_vm4, %v1649_v5, 0  ;;  %p1929_p11 = scmp.ne.s32.totalorder %s2311_s19, %s1928_s1  ;;  %s1934_s3 = scalar_lea.vmem %s1933_s2, 32 }
  0x21   : > { %545 = vst.msk [vmem:[#allocation2 + $0x11] sm:$0xff] %vm542_vm2, %v536_v8  ;;  %v539_v11 = vld [vmem:[%s518_s23 + $0x28] sm:$0xff]  ;;  %546 = vst.msk [vmem:[#allocation2 + $0x19] sm:$0xff] %vm542_vm2, %v537_v9  ;;  %v540_v12 = vld [vmem:[%s518_s23 + $0x30] sm:$0xff]  ;;  %p1935_p0 = scmp.lt.s32.totalorder %s2311_s19, %s1933_s2  ;;  %p1936_p1 = scmp.lt.s32.totalorder %s1934_s3, %s1928_s1 }
  0x22   : > { %v541_v13 = vld [vmem:[%s518_s23 + $0x38] sm:$0xff]  ;;  %547 = vst.msk [vmem:[#allocation2 + $0x21] sm:$0xff] %vm542_vm2, %v538_v10  ;;  %548 = vst.msk [vmem:[#allocation2 + $0x29] sm:$0xff] %vm542_vm2, %v539_v11  ;;  %v1916_v11 = vld [vmem:[%s2359_s7 + $0x8] sm:$0xff]   ;;  %s2309_s23 = scalar_lea.hbm %s2368_s16, %s1696_s29  ;;  %p1930_p12 = pnand %p1929_p11, %p2118_p5 }
  0x23   : > { %549 = vst.msk [vmem:[#allocation2 + $0x31] sm:$0xff] %vm542_vm2, %v540_v12  ;;  %550 = vst.msk [vmem:[#allocation2 + $0x39] sm:$0xff] %vm542_vm2, %v541_v13  ;;  %v1651_v12 = vld [vmem:[%s2357_s5] ss:$0 sm:$0xff]  ;;  %v1927_v5 = vld [vmem:[%s2365_s13 + $0x28] sm:$0xff]   ;;  %p1937_p2 = por %p1936_p1, %p1935_p0 }
  0x24   : > { %p1931_p13 = pneg %p1930_p12 }
  0x26   : > { %p1938_p3 = pnand %p1937_p2, %p1931_p13 }
  0x27   : > { %v551_v14 = vld [vmem:[#allocation2] ss:$2 sm:$0xff]  ;;  %v562_v15 = vld [vmem:[#allocation2 + $0x1] ss:$2 sm:$0xff] }
  0x28   : > { %v691_v16 = vld [vmem:[#allocation2 + $0x2] ss:$2 sm:$0xff]  ;;  %v564_v19 = vld [vmem:[#allocation2 + $0x11] ss:$2 sm:$0xff]  ;;  %v693_v28 = vld [vmem:[#allocation2 + $0x12] ss:$2 sm:$0xff] }
  0x29   : > { %v553_v17 = vld [vmem:[#allocation2 + $0x10] ss:$2 sm:$0xff]  ;;  %v555_v18 = vld [vmem:[#allocation2 + $0x20] ss:$2 sm:$0xff]  ;;  %v569_v22 = vpack.c.bf16 %v564_v19, %v562_v15  ;;  %v566_v23 = vld [vmem:[#allocation2 + $0x21] ss:$2 sm:$0xff]  ;;  %v698_v29 = vpack.c.bf16 %v693_v28, %v691_v16 }
  0x2a   : > { %v558_v20 = vpack.c.bf16 %v553_v17, %v551_v14  ;;  %v557_v21 = vld [vmem:[#allocation2 + $0x30] ss:$2 sm:$0xff]  ;;  %v568_v24 = vld [vmem:[#allocation2 + $0x31] ss:$2 sm:$0xff]  ;;  %v1652_v14 = vld [vmem:[%s2358_s6] ss:$0 sm:$0xff] }
  0x2b   : > { %v559_v25 = vpack.c.bf16 %v557_v21, %v555_v18  ;;  %v570_v27 = vpack.c.bf16 %v568_v24, %v566_v23  ;;  %1738 = vmatprep.mubr.msk.bf16.mxu1 %vm542_vm2, %v569_v22  ;;  %v695_v30 = vld [vmem:[#allocation2 + $0x22] ss:$2 sm:$0xff]  ;;  %v697_v31 = vld [vmem:[#allocation2 + $0x32] ss:$2 sm:$0xff] }
  0x2c   : > { %1744 = vmatprep.mubr.msk.bf16.mxu0 %vm542_vm2, %v558_v20  ;;  %v699_v32 = vpack.c.bf16 %v697_v31, %v695_v30  ;;  %v1918_v28 = vld [vmem:[%s2359_s7 + $0x10] sm:$0xff]  }
  0x2d   : > { %1745 = vmatmul.mubr.msk.bf16.vlgmr.msra.gmra.mrb[0].mxu0 %vm542_vm2, %v559_v25  ;;  %1739 = vmatmul.mubr.msk.bf16.vlgmr.msra.gmra.mrb[0].mxu1 %vm542_vm2, %v570_v27  ;;  %v1917_v25 = vld [vmem:[%s2359_s7] sm:$0xff]  }
  0x2e   : > { %1749 = vmatpush3.bf16.msra.mxu0 %v709_v26  ;;  %1750 = vmatprep.mubr.msk.bf16.mxu0 %vm542_vm2, %v698_v29 }
  0x2f   : > { %1772 = vmatprep.subr.bf16.mxu0 %v1992_v2  ;;  %1756 = vmatprep.mubr.msk.bf16.mxu1 %vm1993_vm5, %v1992_v2 }
  0x30   : > { %1755 = vmatpush3.bf16.msra.mxu1 %v812_v34 }
  0x31   : > { %1760 = vmatprep.subr.bf16.mxu1 %v1992_v2 }
  0x39   : > { %1751 = vmatmul.mubr.msk.bf16.vlgmr.msra.gmra.mrb[0].mxu0 %vm542_vm2, %v699_v32  ;;  %v1919_v32 = vld [vmem:[%s2362_s10 + $0x8] sm:$0xff]  }
  0x3a   : > { %1774 = vmatprep.mubr.msk.bf16.mxu0 %vm1993_vm5, %v1992_v2  ;;  %1773 = vmatpush3.bf16.msra.mxu0 %v1916_v11 }
  0x3b   : > { %1778 = vmatprep.subr.bf16.mxu0 %v1992_v2 }
 0x100   : > { %v1740_v35 = vpop.f32.mrb[0].mxu1 }
 0x101   : > { %v617_v36 = vpop.f32.mrb[1].mxu1 }
 0x102   : > { %v1741_v37 = vpop.f32.mrb[2].mxu1 }
 0x103   : > { %v620_v38 = vpop.f32.mrb[3].mxu1 }
 0x10c   : > { %v1752_v39 = vpop.f32.mrb[0].mxu0 }
 0x10d   : > { %v1832_v41 = vadd.f32 %v1752_v39, %v1740_v35  ;;  %v745_v42 = vpop.f32.mrb[1].mxu0  ;;  %v1664_v35 = vld [vmem:[%s2361_s9] ss:$0 sm:$0xff] }
 0x10e   : > { %v1833_v44 = vadd.f32 %v745_v42, %v617_v36  ;;  %v1753_v45 = vpop.f32.mrb[2].mxu0 }
 0x10f   : > { %v773_v46 = vmul.f32 %v1832_v41, %v1644_v40  ;;  %v1834_v47 = vadd.f32 %v1753_v45, %v1741_v37  ;;  %v748_v48 = vpop.f32.mrb[3].mxu0 }
 0x110   : > { %v771_v49 = vmul.f32 %v1833_v44, %v1644_v40  ;;  %v1835_v50 = vadd.f32 %v748_v48, %v620_v38 }
 0x111   : > { %v784_v51 = vadd.f32 %v1645_v43, %v773_v46  ;;  %v774_v52 = vmul.f32 %v1834_v47, %v1644_v40  ;;  %v1921_v46 = vld [vmem:[%s2362_s10 + $0x10] sm:$0xff]  }
 0x112   : > { %v782_v53 = vadd.f32 %v1645_v43, %v771_v49  ;;  %v772_v54 = vmul.f32 %v1835_v50, %v1644_v40  ;;  %v1922_v50 = vld [vmem:[%s2365_s13 + $0x10] sm:$0xff]  }
 0x113   : > { %v788_v55 = vmax.f32 %v784_v51, 0.0  ;;  %v785_v56 = vadd.f32 %v1645_v43, %v774_v52  ;;  %v1923_v51 = vld [vmem:[%s2365_s13 + $0x18] sm:$0xff]   ;;  %v1675_v52 = vld [vmem:[%s2363_s11] ss:$0 sm:$0xff] }
 0x114   : > { %v786_v57 = vmax.f32 %v782_v53, 0.0  ;;  %v783_v58 = vadd.f32 %v1645_v43, %v772_v54  ;;  %v1920_v43 = vld [vmem:[%s2362_s10] sm:$0xff]  }
 0x115   : > { %793 = vst.msk [vmem:[#allocation3 + $0x11] sm:$0xff] %vm790_vm6, %v788_v55  ;;  %v789_v59 = vmax.f32 %v785_v56, 0.0  ;;  %v1676_v54 = vld [vmem:[%s2364_s12] ss:$0 sm:$0xff] }
 0x116   : > { %791 = vst.msk [vmem:[#allocation3 + $0x1] sm:$0xff] %vm790_vm6, %v786_v57  ;;  %v787_v60 = vmax.f32 %v783_v58, 0.0 }
 0x117   : > { %794 = vst.msk [vmem:[#allocation3 + $0x19] sm:$0xff] %vm790_vm6, %v789_v59 }
 0x118   : > { %792 = vst.msk [vmem:[#allocation3 + $0x9] sm:$0xff] %vm790_vm6, %v787_v60 }
 0x11e   : > { %v803_v62 = vld [vmem:[#allocation3 + $0x11] ss:$2 sm:$0xff]  ;;  %v905_v9 = vld [vmem:[#allocation3 + $0x12] ss:$2 sm:$0xff] }
 0x11f   : > { %v801_v63 = vld [vmem:[#allocation3 + $0x1] ss:$2 sm:$0xff]  ;;  %v795_v3 = vld [vmem:[#allocation3] ss:$2 sm:$0xff]  ;;  %v797_v4 = vld [vmem:[#allocation3 + $0x10] ss:$2 sm:$0xff] }
 0x120   : > { %v804_v0 = vpack.c.bf16 %v803_v62, %v801_v63  ;;  %v798_v6 = vpack.c.bf16 %v797_v4, %v795_v3  ;;  %v903_v8 = vld [vmem:[#allocation3 + $0x2] ss:$2 sm:$0xff]  ;;  %v1924_v62 = vld [vmem:[%s2365_s13] sm:$0xff]  }
 0x121   : > { %v906_v10 = vpack.c.bf16 %v905_v9, %v903_v8  ;;  %v1926_v3 = vld [vmem:[%s2365_s13 + $0x20] sm:$0xff]  }
 0x122   : > { %1757 = vmatmul.mubr.msk.bf16.vlgmr.msra.gmra.mrb[4].mxu1 %vm790_vm6, %v804_v0  ;;  %v1925_v0 = vld [vmem:[%s2365_s13 + $0x8] sm:$0xff]   ;;  %v1694_v8 = vld [vmem:[%s2366_s14] ss:$0 sm:$0xff] }
 0x123   : > { %1761 = vmatpush3.bf16.msra.mxu1 %v859_v1  ;;  %1762 = vmatprep.mubr.msk.bf16.mxu1 %vm1993_vm5, %v1992_v2 }
 0x124   : > { %1766 = vmatprep.subr.bf16.mxu1 %v1992_v2 }
 0x12e   : > { %1763 = vmatmul.mubr.msk.bf16.vlgmr.msra.gmra.mrb[4].mxu1 %vm790_vm6, %v798_v6 }
 0x12f   : > { %1767 = vmatpush3.bf16.msra.mxu1 %v913_v7  ;;  %1768 = vmatprep.mubr.msk.bf16.mxu1 %vm1993_vm5, %v1992_v2 }
 0x130   : > { %1790 = vmatprep.subr.bf16.mxu1 %v1992_v2 }
 0x13a   : > { %1769 = vmatmul.mubr.msk.bf16.vlgmr.msra.gmra.mrb[4].mxu1 %vm790_vm6, %v906_v10  ;;  %v1695_v10 = vld [vmem:[%s2367_s15] ss:$0 sm:$0xff] }
 0x13b   : > { %1792 = vmatprep.mubr.msk.bf16.mxu1 %vm1993_vm5, %v1992_v2  ;;  %1791 = vmatpush3.bf16.msra.mxu1 %v1919_v32 }
 0x13c   : > { %1796 = vmatprep.subr.bf16.mxu1 %v1992_v2 }
 0x20d   : > { %v949_v13 = vpop.f32.mrb[4].mxu1 }
 0x20e   : > { %v965_v15 = vmul.f32 %v1651_v12, %v949_v13  ;;  %v1770_v16 = vpop.f32.mrb[5].mxu1 }
 0x20f   : > { %v952_v17 = vpop.f32.mrb[6].mxu1 }
 0x210   : > { %v974_v18 = vadd.f32 %v1652_v14, %v965_v15  ;;  %v966_v19 = vmul.f32 %v1651_v12, %v952_v17  ;;  %v1771_v20 = vpop.f32.mrb[7].mxu1 }
 0x212   : > { %v976_v21 = vmax.f32 %v974_v18, 0.0  ;;  %v975_v22 = vadd.f32 %v1652_v14, %v966_v19 }
 0x214   : > { %979 = vst.msk [vmem:[#allocation4 + $0x1] sm:$0xff] %vm978_vm8, %v976_v21  ;;  %v977_v23 = vmax.f32 %v975_v22, 0.0 }
 0x216   : > { %980 = vst.msk [vmem:[#allocation4 + $0x9] sm:$0xff] %vm978_vm8, %v977_v23 }
 0x21d   : > { %v986_v24 = vld [vmem:[#allocation4 + $0x1] ss:$2 sm:$0xff]  ;;  %v981_v27 = vld [vmem:[#allocation4] ss:$2 sm:$0xff] }
 0x21e   : > { %v987_v26 = vpack.c.bf16 %v986_v24, %v986_v24  ;;  %v982_v29 = vpack.c.bf16 %v981_v27, %v981_v27  ;;  %v1090_v30 = vld [vmem:[#allocation4 + $0x2] ss:$2 sm:$0xff] }
 0x21f   : > { %v1091_v31 = vpack.c.bf16 %v1090_v30, %v1090_v30 }
 0x220   : > { %1775 = vmatmul.mubr.msk.bf16.vlgmr.msra.gmra.mrb[4].mxu0 %vm978_vm8, %v987_v26 }
 0x221   : > { %1779 = vmatpush3.bf16.msra.mxu0 %v1917_v25  ;;  %1780 = vmatprep.mubr.msk.bf16.mxu0 %vm1993_vm5, %v1992_v2 }
 0x222   : > { %1784 = vmatprep.subr.bf16.mxu0 %v1992_v2 }
 0x22c   : > { %1781 = vmatmul.mubr.msk.bf16.vlgmr.msra.gmra.mrb[4].mxu0 %vm978_vm8, %v982_v29 }
 0x22d   : > { %1785 = vmatpush3.bf16.msra.mxu0 %v1918_v28  ;;  %1786 = vmatprep.mubr.msk.bf16.mxu0 %vm1993_vm5, %v1992_v2 }
 0x22e   : > { %1808 = vmatprep.subr.bf16.mxu0 %v1992_v2 }
 0x238   : > { %1787 = vmatmul.mubr.msk.bf16.vlgmr.msra.gmra.mrb[4].mxu0 %vm978_vm8, %v1091_v31 }
 0x239   : > { %1812 = vmatprep.mubr.msk.bf16.mxu0 %vm1993_vm5, %v1992_v2  ;;  %1809 = vmatpush3.bf16.msra.mxu0 %v1922_v50 }
 0x23a   : > { %1810 = vmatprep.subr.bf16.mxu0 %v1992_v2 }
 0x23d   : > { %1811 = vmatpush3.bf16.msra.mxu0 %v1923_v51 }
 0x23e   : > { %1816 = vmatprep.subr.bf16.mxu0 %v1992_v2 }
 0x30b   : > { %v1138_v34 = vpop.f32.mrb[4].mxu0 }
 0x30c   : > { %v1152_v36 = vmul.f32 %v1663_v33, %v1138_v34  ;;  %v1788_v37 = vpop.f32.mrb[5].mxu0 }
 0x30d   : > { %v1141_v38 = vpop.f32.mrb[6].mxu0 }
 0x30e   : > { %v1160_v39 = vadd.f32 %v1664_v35, %v1152_v36  ;;  %v1789_v40 = vpop.f32.mrb[7].mxu0 }
 0x310   : > { %v1161_v41 = vmax.f32 %v1160_v39, 0.0 }
 0x312   : > { %1162 = vst.msk [vmem:[#allocation5 + $0x1] sm:$0xff] %vm978_vm8, %v1161_v41 }
 0x319   : > { %v1168_v42 = vld [vmem:[#allocation5 + $0x1] ss:$2 sm:$0xf]  ;;  %v1163_v45 = vld [vmem:[#allocation5] ss:$2 sm:$0xf] }
 0x31a   : > { %v1169_v44 = vpack.c.bf16 %v1168_v42, %v1168_v42  ;;  %v1164_v47 = vpack.c.bf16 %v1163_v45, %v1163_v45  ;;  %v1272_v48 = vld [vmem:[#allocation5 + $0x2] ss:$2 sm:$0xf] }
 0x31b   : > { %v1273_v49 = vpack.c.bf16 %v1272_v48, %v1272_v48 }
 0x31c   : > { %1793 = vmatmul.mubr.msk.bf16.vlgmr.msra.gmra.mrb[8].mxu1 %vm978_vm8, %v1169_v44 }
 0x31d   : > { %1797 = vmatpush3.bf16.msra.mxu1 %v1920_v43  ;;  %1798 = vmatprep.mubr.msk.bf16.mxu1 %vm1993_vm5, %v1992_v2 }
 0x31e   : > { %1802 = vmatprep.subr.bf16.mxu1 %v1992_v2 }
 0x328   : > { %1799 = vmatmul.mubr.msk.bf16.vlgmr.msra.gmra.mrb[8].mxu1 %vm978_vm8, %v1164_v47 }
 0x329   : > { %1803 = vmatpush3.bf16.msra.mxu1 %v1921_v46  ;;  %1804 = vmatprep.mubr.msk.bf16.mxu1 %vm1993_vm5, %v1992_v2 }
 0x334   : > { %1805 = vmatmul.mubr.msk.bf16.vlgmr.msra.gmra.mrb[8].mxu1 %vm978_vm8, %v1273_v49 }
 0x407   : > { %v1320_v53 = vpop.f32.mrb[8].mxu1 }
 0x408   : > { %v1334_v55 = vmul.f32 %v1675_v52, %v1320_v53  ;;  %v1806_v56 = vpop.f32.mrb[9].mxu1 }
 0x409   : > { %v1323_v57 = vpop.f32.mrb[10].mxu1 }
 0x40a   : > { %v1342_v58 = vadd.f32 %v1676_v54, %v1334_v55  ;;  %v1807_v59 = vpop.f32.mrb[11].mxu1 }
 0x40c   : > { %v1343_v60 = vmax.f32 %v1342_v58, 0.0 }
 0x40e   : > { %1345 = vst.msk [vmem:[#allocation6 + $0x1] sm:$0xf] %vm1344_vm10, %v1343_v60 }
 0x415   : > { %v1353_v61 = vld [vmem:[#allocation6 + $0x1] ss:$2 sm:$0x3]  ;;  %v1346_v1 = vld [vmem:[#allocation6] ss:$2 sm:$0x3] }
 0x416   : > { %v1354_v63 = vpack.c.bf16 %v1353_v61, %v1353_v61  ;;  %v1347_v4 = vpack.c.bf16 %v1346_v1, %v1346_v1  ;;  %v1472_v6 = vld [vmem:[#allocation6 + $0x2] ss:$2 sm:$0x3] }
 0x417   : > { %v1473_v7 = vpack.c.bf16 %v1472_v6, %v1472_v6 }
 0x418   : > { %1813 = vmatmul.mubr.msk.bf16.vlgmr.msra.gmra.mrb[8].mxu0 %vm1372_vm11, %v1354_v63 }
 0x419   : > { %1817 = vmatpush3.bf16.msra.mxu0 %v1924_v62  ;;  %1820 = vmatprep.mubr.msk.bf16.mxu0 %vm1993_vm5, %v1992_v2 }
 0x41a   : > { %1818 = vmatprep.subr.bf16.mxu0 %v1992_v2 }
 0x41d   : > { %1819 = vmatpush3.bf16.msra.mxu0 %v1925_v0 }
 0x41e   : > { %1824 = vmatprep.subr.bf16.mxu0 %v1992_v2 }
 0x424   : > { %1821 = vmatmul.mubr.msk.bf16.vlgmr.msra.gmra.mrb[8].mxu0 %vm1372_vm11, %v1347_v4 }
 0x425   : > { %1825 = vmatpush3.bf16.msra.mxu0 %v1926_v3  ;;  %1828 = vmatprep.mubr.msk.bf16.mxu0 %vm1993_vm5, %v1992_v2 }
 0x426   : > { %1826 = vmatprep.subr.bf16.mxu0 %v1992_v2 }
 0x429   : > { %1827 = vmatpush3.bf16.msra.mxu0 %v1927_v5 }
 0x430   : > { %1829 = vmatmul.mubr.msk.bf16.vlgmr.msra.gmra.mrb[8].mxu0 %vm1372_vm11, %v1473_v7 }
 0x503   : > { %v1528_v9 = vpop.f32.mrb[8].mxu0 }
 0x504   : > { %v1542_v11 = vmul.f32 %v1694_v8, %v1528_v9  ;;  %v1830_v12 = vpop.f32.mrb[9].mxu0 }
 0x505   : > { %v1531_v2 = vpop.f32.mrb[10].mxu0 }
 0x506   : > { %v1550_v13 = vadd.f32 %v1695_v10, %v1542_v11  ;;  %v1831_v14 = vpop.f32.mrb[11].mxu0 }
 0x508   : > { %v1552_v15 = vsel %vm1551_vm12, %v1550_v13, 0.0 }
 0x509   : > { %v1553_v16 = vrot.slane %v1552_v15, 4 }
 0x50b   : > { %v1554_v17 = vadd.f32 %v1553_v16, %v1552_v15 }
 0x50d   : > { %v1555_v18 = vrot.slane %v1554_v17, 2 }
 0x50f   : > { %v1556_v19 = vadd.f32 %v1555_v18, %v1554_v17 }
 0x511   : > { %v1557_v20 = vrot.slane %v1556_v19, 1 }
 0x513   : > { %v1558_v21 = vadd.f32 %v1557_v20, %v1556_v19 }
 0x515   : > { %v1560_v22 = vmul.f32 0.5, %v1558_v21 }
 0x517   : > { %1561 = vst.msk [vmem:[%s513_s18] sm:$0x1] %vm531_vm9, %v1560_v22 }
 0x518   : > { %1941 = shalt.err (!%p1938_p3)
}
 0x519   : > { %s1942_s28 = scalar_lea.hbm %s2309_s23, 16  ;;  %s1946_s20 = scalar_lea.hbm %s2368_s16, 32 }
 0x51a   : > { %p1943_p4 = scmp.ne.s32.totalorder %s2309_s23, %s1942_s28  ;;  %p1947_p9 = scmp.lt.u32.totalorder %s2309_s23, %s2368_s16 }
 0x51b   : > { %p1948_p10 = scmp.lt.u32.totalorder %s1946_s20, %s1942_s28  ;;  %p1950_p12 = scmp.lt.u32.totalorder %s1942_s28, %s2309_s23 }
 0x51c   : > { %p1944_p7 = pnand %p1943_p4, %p2118_p5 }
 0x51d   : > { %p1949_p11 = por %p1948_p10, %p1947_p9 }
 0x51e   : > { %p1945_p8 = pneg %p1944_p7 }
 0x51f   : > { %p1951_p13 = por %p1950_p12, %p1949_p11 }
 0x521   : > { %p1952_p0 = pnand %p1951_p13, %p1945_p8 }
 0x523   : > { %1955 = shalt.err (!%p1952_p0)
}
 0x524   : > { %1875 = dma.vmem_to_hbm [thread:$0]  (%p2118_p5), %s2311_s19, 16, %s2309_s23, %s1563_s30  }
 0x525 PF: > { %p1881_p1 = scmp.ge.s32.totalorder %s1990_s24, 2  ;;  %s1587_s1 = sand.u32 1, %s1978_s21  }
 0x526   : > { %s1588_s3 = scalar_lea.sflag [#allocation8], %s1587_s1 }
 0x527   : > { %p1878_p2 = pnand %p1881_p1, %p2122_p6 }
 0x529   : > { %1973 = dma.done.wait (!%p1878_p2), %s1588_s3, 16  }
 0x52a   : > { %1975 = vsyncadd (!%p1878_p2), %s1588_s3, 4294967280  ;;  %s2382_s25 = sld [smem:[#allocation10_spill]]  ;;  %s2383_s23 = sld [smem:[#allocation11_spill]] }
 0x52b   : > { %p26_p3 = scmp.ge.s32.totalorder %s2105_s27, 4   ;;  %s2384_s21 = smov %s1982_s22 }
 0x52c   : > { %s2386_s24 = smov %s2105_s27 }
 0x52d   :  { %28 = sbr.rel (!%p26_p3) target bundleno = 8 (0x8), region = 151 }
 0x530   : > { %s2385_s22 = smov %s2382_s25 }
 0x534   :  { %1592 = vsyncpa [#allocation8], 1 }
 0x535   :  { %1594 = vsyncpa [#allocation8 + $0x1], 1 }

</bundles_post_ra>
